<compile_context>
chip_gen: v6e
topology: v6e:2x2x1
jax: 0.10.0
libtpu: 0.0.40
codegen_flags: <defaults>
</compile_context>

<pallas_src>
import functools

import jax
import jax.numpy as jnp
from jax.experimental import pallas as pl
from jax.experimental.pallas import tpu as pltpu

_LANE = 128


def _round_up(x, m):
    return ((x + m - 1) // m) * m


def _gem_kernel(p_ref, x_ref, o_ref, *, eps, inv_hw, lane_dense_out):
    # p_ref: (1,) learnable exponent in SMEM
    # x_ref: (row_tile, H*W) tile of the flattened input in VMEM
    # o_ref: (1, row_tile) lane-dense output tile, or (row_tile, 1) fallback
    p = p_ref[0]
    inv_p = 1.0 / p                                         # hoisted scalar; no vector divide
    x = jnp.maximum(x_ref[...].astype(jnp.float32), eps)    # clamp(min=eps) -> strictly > 0
    # x ** p via exp(p * log(x)); p is a learned runtime scalar, so no static
    # integer fast path applies.
    xp = jnp.exp(p * jnp.log(x))
    if lane_dense_out:
        s = jnp.sum(xp, axis=-1)                            # (row_tile,)
        m = s.reshape(1, s.shape[0]) * inv_hw               # lane-dense (1, row_tile)
    else:
        m = jnp.sum(xp, axis=-1, keepdims=True) * inv_hw    # (row_tile, 1) fallback
    o_ref[...] = jnp.exp(jnp.log(m) * inv_p).astype(o_ref.dtype)   # ** (1/p)


def gem_pallas(x, p, eps=1e-6):
    """x: (N, C, H, W), p: (1,) learnable exponent. Returns (N, C, 1, 1)."""
    N, C, H, W = x.shape
    rows = N * C
    hw = H * W

    dtype = x.dtype
    dbytes = jnp.dtype(dtype).itemsize
    sublane = {4: 8, 2: 16, 1: 32}.get(dbytes, 8)       # packed-sublane multiple
    lane_hw = _round_up(hw, _LANE)                      # lane padding inside VMEM

    # --- Tile selection ------------------------------------------------------
    # True VMEM footprint per block: double-buffered native-dtype input tile plus
    # the f32 intermediates (upcast x and x**p) Mosaic materializes.
    per_row_bytes = lane_hw * (2 * dbytes + 2 * 4)
    budget_bytes = 24 * 1024 * 1024                     # headroom inside 32 MiB scope
    max_rows_vmem = max(sublane, budget_bytes // per_row_bytes)

    if rows <= _LANE and rows <= max_rows_vmem:
        # Few rows: one full-extent block (block == array dims, always legal).
        lane_dense, row_tile, num_tiles = True, rows, 1
    elif max_rows_vmem >= _LANE:
        # Common path: lane-dense output needs row_tile % 128 == 0.  Target ~8
        # grid steps for DMA/compute overlap; prefer an even count for v7x's
        # two TensorCores.
        lane_dense = True
        row_tile = _round_up(pl.cdiv(rows, 8), _LANE)
        row_tile = min(row_tile, (max_rows_vmem // _LANE) * _LANE, 8192)
        num_tiles = pl.cdiv(rows, row_tile)
        if num_tiles > 1 and num_tiles % 2 == 1:
            for cand in range(row_tile, 0, -_LANE):
                nt = pl.cdiv(rows, cand)
                if nt % 2 == 0:
                    row_tile, num_tiles = cand, nt
                    break
    else:
        # Very large H*W: even a 128-row tile would overflow the budget.  Fall
        # back to narrow sublane-multiple row tiles with a lane-sparse output;
        # the hw-long main loop dominates so the epilogue/store cost is noise.
        # (Further improvement: strip-mine hw with a partial-sum accumulator.)
        lane_dense = False
        row_tile = max(sublane, (max_rows_vmem // sublane) * sublane)
        num_tiles = pl.cdiv(rows, row_tile)

    # --- Data prep: reshape only (no padding -> no extra HBM pass) ------------
    x2 = x.reshape(rows, hw)
    p_arr = jnp.asarray(p, dtype=jnp.float32).reshape(1)

    if lane_dense:
        out_shape = jax.ShapeDtypeStruct((1, num_tiles * row_tile), dtype)
        out_spec = pl.BlockSpec((1, row_tile), lambda i: (0, i))
    else:
        out_shape = jax.ShapeDtypeStruct((rows, 1), dtype)
        out_spec = pl.BlockSpec((row_tile, 1), lambda i: (i, 0))

    vmem_limit = max(32 * 1024 * 1024,
                     row_tile * per_row_bytes + 2 * 1024 * 1024)

    out = pl.pallas_call(
        functools.partial(_gem_kernel, eps=float(eps), inv_hw=1.0 / hw,
                          lane_dense_out=lane_dense),
        out_shape=out_shape,
        grid=(num_tiles,),
        in_specs=[
            pl.BlockSpec(memory_space=pltpu.MemorySpace.SMEM),   # p (learned scalar)
            pl.BlockSpec((row_tile, hw), lambda i: (i, 0)),      # x row tile
        ],
        out_specs=out_spec,
        compiler_params=pltpu.CompilerParams(
            dimension_semantics=("parallel",),
            vmem_limit_bytes=vmem_limit,
        ),
    )(p_arr, x2)

    if lane_dense:
        return out.reshape(-1)[:rows].reshape(N, C, 1, 1)
    return out.reshape(N, C, 1, 1)


def gem_reference(x, p, eps=1e-6):
    """Pure-JAX reference matching the PyTorch semantics."""
    pv = jnp.asarray(p, jnp.float32).reshape(())
    xc = jnp.maximum(x.astype(jnp.float32), eps)
    m = jnp.mean(xc ** pv, axis=(-2, -1), keepdims=True)
    return (m ** (1.0 / pv)).astype(x.dtype)


if __name__ == "__main__":
    key = jax.random.PRNGKey(0)
    N, C, H, W = 2, 4, 16, 16
    x = jax.random.normal(key, (N, C, H, W), dtype=jnp.float32)

    # Deterministic parameter init, as in GeM.__init__: p = ones(1) * 3
    p = jnp.ones((1,), dtype=jnp.float32) * 3.0

    out = gem_pallas(x, p, eps=1e-6)
    out = jax.block_until_ready(out)

    ref = gem_reference(x, p, eps=1e-6)
    assert out.shape == (N, C, 1, 1)
    assert jnp.allclose(out, ref, rtol=1e-4, atol=1e-5), "mismatch vs reference"

    print("KERNEL_OK")
</pallas_src>

<mosaic_0001>
module attributes {stable_mosaic.version = 11 : i64} {
  func.func @_gem_kernel(%arg0: i32, %arg1: memref<1xf32, #tpu.memory_space<smem>>, %arg2: memref<8x256xf32, #tpu.memory_space<vmem>>, %arg3: memref<1x8xf32, #tpu.memory_space<vmem>>) attributes {dimension_semantics = [#tpu.dimension_semantics<parallel>], iteration_bounds = array<i64: 1>, scalar_prefetch = 0 : i64, scratch_operands = 0 : i64, tpu.core_type = #tpu.core_type<tc>, window_params = [{transform_indices = @transform_0, window_bounds = array<i64: 1>}, {transform_indices = @transform_1, window_bounds = array<i64: 8, 256>}, {transform_indices = @transform_2, window_bounds = array<i64: 1, 8>}]} {
    %c0 = arith.constant 0 : index
    %0 = memref.load %arg1[%c0] : memref<1xf32, #tpu.memory_space<smem>>
    %cst = arith.constant 1.000000e+00 : f32
    %1 = arith.divf %cst, %0 : f32
    %c0_0 = arith.constant 0 : index
    %c0_1 = arith.constant 0 : index
    %2 = vector.load %arg2[%c0_0, %c0_1] : memref<8x256xf32, #tpu.memory_space<vmem>>, vector<8x256xf32>
    %cst_2 = arith.constant 9.99999997E-7 : f32
    %3 = vector.broadcast %cst_2 : f32 to vector<8x256xf32>
    %4 = arith.maximumf %2, %3 : vector<8x256xf32>
    %5 = math.log %4 : vector<8x256xf32>
    %6 = vector.broadcast %0 : f32 to vector<8x256xf32>
    %7 = arith.mulf %6, %5 : vector<8x256xf32>
    %8 = math.exp %7 : vector<8x256xf32>
    %cst_3 = arith.constant dense<0.000000e+00> : vector<8xf32>
    %9 = vector.multi_reduction <add>, %8, %cst_3 [1] : vector<8x256xf32> to vector<8xf32>
    %10 = vector.shape_cast %9 : vector<8xf32> to vector<1x8xf32>
    %cst_4 = arith.constant 3.906250e-03 : f32
    %11 = vector.broadcast %cst_4 : f32 to vector<1x8xf32>
    %12 = arith.mulf %10, %11 : vector<1x8xf32>
    %13 = math.log %12 : vector<1x8xf32>
    %14 = vector.broadcast %1 : f32 to vector<1x8xf32>
    %15 = arith.mulf %13, %14 : vector<1x8xf32>
    %16 = math.exp %15 : vector<1x8xf32>
    %c0_5 = arith.constant 0 : index
    %c0_6 = arith.constant 0 : index
    %17 = vector.load %arg3[%c0_5, %c0_6] : memref<1x8xf32, #tpu.memory_space<vmem>>, vector<1x8xf32>
    tpu.vector_store %arg3[%c0_5, %c0_6], %16 {strides = array<i32>} : memref<1x8xf32, #tpu.memory_space<vmem>>, vector<1x8xf32>,
    return
  }
  func.func @transform_0(%arg0: i32) -> i32 {
    %c0_i32 = arith.constant 0 : i32
    %c0_i32_0 = arith.constant 0 : i32
    return %c0_i32 : i32
  }
  func.func @transform_1(%arg0: i32) -> (i32, i32) {
    %c0_i32 = arith.constant 0 : i32
    %c0_i32_0 = arith.constant 0 : i32
    return %arg0, %c0_i32 : i32, i32
  }
  func.func @transform_2(%arg0: i32) -> (i32, i32) {
    %c0_i32 = arith.constant 0 : i32
    %c0_i32_0 = arith.constant 0 : i32
    return %c0_i32, %arg0 : i32, i32
  }
}

</mosaic_0001>

<bundles_post_ra>
// kernel: tpu_custom_call.1
= control target key start
LH: loop header
LB: loop body
LE: loop exit
PB: predicated region body
PF: predicated region fallthrough
CT: control target
= control target key end

     0   :  { %8 = vsyncpa [#allocation4], 0  ;;  %s167_s0 = inlined_call_operand.<no memory space> [shape: f32[1], index: 0, kind: input, shape index: {}]   ;;  %s168_s1 = inlined_call_operand.hbm [shape: f32[8,256], index: 1, kind: input, shape index: {}]   ;;  %s169_s2 = inlined_call_operand.hbm [shape: f32[1,8], index: 2, kind: output, shape index: {}]  }
   0x1   :  { %9 = vsyncpa [#allocation5], 0  ;;  %s141_s9 = smov [#allocation3]  }
   0x2   :  { %s18_s10 = sshll.u32 %s141_s9, 4  ;;  %s19_s10 = int_to_ptr.vmem [resolvable:$true] %s18_s10 }
   0x3   :  { %s105_s11 = scalar_lea.vmem %s19_s10, 256  ;;  %p110_p1 = scmp.lt.s32.totalorder %s19_s10, %s19_s10 }
   0x4   :  { %p106_p0 = scmp.ne.s32.totalorder %s19_s10, %s105_s11  ;;  %p111_p2 = scmp.lt.s32.totalorder %s105_s11, %s105_s11 }
   0x6   :  { %p112_p3 = por %p111_p2, %p110_p1 }
   0x8   :  { %p113_p4 = pnand %p112_p3, %p106_p0 }
   0xa   :  { %116 = shalt.err (!%p113_p4)
}
   0xb   :  { %21 = dma.hbm_to_vmem [thread:$0]  %s168_s1, 256, %s19_s10, [#allocation4]  }
   0xc   :  { %137 = dma.done.wait [#allocation4], 256  }
   0xd   :  { %138 = vsyncadd [#allocation4], 4294967040  ;;  %v26_v0 = vstv %s167_s0  ;;  %v29_v1 = vld [vmem:[#allocation3] sm:$0xff]  ;;  %v30_v2 = vld [vmem:[#allocation3 + $0x8] sm:$0xff]  ;;  %v55_v24 = vlaneseq  ;;  %s142_s1 = smov [#allocation6]   ;;  %vm62_vm0 = vcmask 57344  }
   0xe   :  { %83 = vrcp.f32 %v26_v0  ;;  %v31_v3 = vmax.f32 %v29_v1, 1e-06  ;;  %v32_v4 = vmax.f32 %v30_v2, 1e-06  ;;  %s70_s16 = sshll.u32 %s142_s1, 4  ;;  %s71_s16 = int_to_ptr.vmem [resolvable:$true] %s70_s16 }
   0xf   :  { %v56_v25 = vand.u32 127, %v55_v24  ;;  %v58_v26 = vshrl.u32 %v55_v24, 7  ;;  %s117_s17 = scalar_lea.vmem %s71_s16, 16  ;;  %s121_s18 = scalar_lea.vmem %s71_s16, 32 }
  0x10   :  { %85 = vlog2.f32 %v31_v3  ;;  %p118_p5 = scmp.ne.s32.totalorder %s71_s16, %s117_s17  ;;  %p122_p6 = scmp.lt.s32.totalorder %s71_s16, %s71_s16 }
  0x11   :  { %87 = vlog2.f32 %v32_v4  ;;  %v59_v27 = vsub.s32 %v56_v25, %v58_v26  ;;  %p123_p7 = scmp.lt.s32.totalorder %s121_s18, %s117_s17 }
  0x13   :  { %p124_p8 = por %p123_p7, %p122_p6 }
  0x15   :  { %p125_p9 = pnand %p124_p8, %p118_p5 }
  0x1b   :  { %v84_v5 = vpop.eup %83 }
  0x1c   :  { %79 = vpush %v84_v5 }
  0x1d   :  { %v86_v6 = vpop.eup %85 }
  0x1e   :  { %v88_v7 = vpop.eup %87  ;;  %v34_v8 = vmul.f32 0.6931472, %v86_v6 }
  0x1f   :  { %v36_v9 = vmul.f32 0.6931472, %v88_v7 }
  0x20   :  { %v38_v10 = vmul.f32 %v34_v8, %v26_v0 }
  0x21   :  { %v39_v11 = vmul.f32 %v36_v9, %v26_v0 }
  0x22   :  { %v40_v12 = vmul.f32 1.442695, %v38_v10 }
  0x23   :  { %v42_v13 = vmul.f32 1.442695, %v39_v11 }
  0x24   :  { %89 = vpow2.f32 %v40_v12 }
  0x25   :  { %91 = vpow2.f32 %v42_v13 }
  0x31   :  { %v90_v14 = vpop.eup %89 }
  0x32   :  { %v92_v15 = vpop.eup %91 }
  0x33   :  { %v44_v16 = vadd.f32 %v92_v15, %v90_v14 }
  0x35   :  { %45 = vadd.xlane.f32.xlu0 %v44_v16 }
  0x4d   :  { %s80_s0 = spop %79 }
  0x4e   :  { %v50_v20 = vstv %s80_s0 }
  0xbe   :  { %v46_v17 = vpop.xlane.xlu0 %45 }
  0xbf   :  { %v47_v18 = vmul.f32 0.00390625, %v46_v17 }
  0xc1   :  { %93 = vlog2.f32 %v47_v18 }
  0xce   :  { %v94_v19 = vpop.eup %93 }
  0xcf   :  { %v49_v21 = vmul.f32 0.6931472, %v94_v19 }
  0xd1   :  { %v51_v22 = vmul.f32 %v50_v20, %v49_v21 }
  0xd3   :  { %v52_v23 = vmul.f32 1.442695, %v51_v22 }
  0xd5   :  { %95 = vpow2.f32 %v52_v23 }
  0xe2   :  { %v96_v28 = vpop.eup %95 }
  0xe3   :  { %v60_v29 = vrot.slane %v96_v28, %v59_v27 }
  0xe5   :  { %63 = vst.msk [vmem:[#allocation6] sm:$0x1] %vm62_vm0, %v60_v29 }
  0xe6   :  { %128 = shalt.err (!%p125_p9)
}
  0xe7   :  { %73 = dma.vmem_to_hbm [thread:$0]  %s71_s16, 16, %s169_s2, [#allocation5]  }
  0xe8   :  { %139 = dma.done.wait [#allocation5], 16  }
  0xe9   :  { %140 = vsyncadd [#allocation5], 4294967280 }
  0xea   :  { %77 = vsyncpa [#allocation4], 1 }
  0xeb   :  { %78 = vsyncpa [#allocation5], 1 }

</bundles_post_ra>
